<compile_context>
chip_gen: v6e
topology: v6e:2x2x1
jax: 0.10.0
libtpu: 0.0.40
codegen_flags: <defaults>
</compile_context>

<pallas_src>
import functools

import jax
import jax.numpy as jnp
from jax import lax
from jax.experimental import pallas as pl
from jax.experimental.pallas import tpu as pltpu


def _round_up(x, m):
    return (x + m - 1) // m * m


def _linear_bn_silu_dropout_kernel(seed_ref, x_ref, w_ref, b_ref, gamma_ref,
                                   beta_ref, o_ref, *, n_valid, tn, cout_pad,
                                   dropout_p, eps):
    # Per grid step j (out-channel tile):
    #   seed_ref:  (1,)          SMEM int32 (scalar prefetch)
    #   x_ref:     (N_pad, K_pad) bf16  (same block every step)
    #   w_ref:     (K_pad, TN)    bf16  (pre-transposed Linear weight tile)
    #   b_ref, gamma_ref, beta_ref: (1, TN) f32
    #   o_ref:     (N_pad, TN)    f32
    j = pl.program_id(0)
    n_pad = x_ref.shape[0]

    # ---- Linear on the MXU: bf16 operands, f32 accumulate ----
    y = jnp.dot(x_ref[...], w_ref[...],
                preferred_element_type=jnp.float32) + b_ref[...]

    # ---- BatchNorm1d training-mode stats, one pass (E[y], E[y^2]) ----
    if n_pad != n_valid:
        row_ok = lax.broadcasted_iota(jnp.int32, (n_pad, 1), 0) < n_valid
        ym = jnp.where(row_ok, y, 0.0)
    else:
        ym = y
    inv_n = jnp.float32(1.0 / n_valid)
    mean = jnp.sum(ym, axis=0, keepdims=True) * inv_n
    var = jnp.maximum(
        jnp.sum(ym * ym, axis=0, keepdims=True) * inv_n - mean * mean, 0.0)
    z = (y - mean) * lax.rsqrt(var + eps) * gamma_ref[...] + beta_ref[...]

    # ---- SiLU ----
    s = z * jax.nn.sigmoid(z)

    # ---- Dropout (training mode), stateless integer-hash PRNG ----
    if dropout_p > 0.0:
        rows = lax.broadcasted_iota(jnp.int32, s.shape, 0)
        cols = lax.broadcasted_iota(jnp.int32, s.shape, 1) + j * tn
        flat = (rows * cout_pad + cols).astype(jnp.uint32)
        h = flat + seed_ref[0].astype(jnp.uint32) * jnp.uint32(0x9E3779B9)
        # splitmix32-style finalizer
        h = (h ^ (h >> jnp.uint32(16))) * jnp.uint32(0x85EBCA6B)
        h = (h ^ (h >> jnp.uint32(13))) * jnp.uint32(0xC2B2AE35)
        h = h ^ (h >> jnp.uint32(16))
        u31 = (h >> jnp.uint32(1)).astype(jnp.int32)          # uniform in [0, 2^31)
        thresh = jnp.int32(int(round(dropout_p * float(1 << 31))))
        keep = u31 >= thresh                                   # P(keep) = 1 - p
        s = jnp.where(keep, s * jnp.float32(1.0 / (1.0 - dropout_p)), 0.0)
        # TODO(synk): PyTorch's dropout RNG stream cannot be reproduced
        # bit-exactly; a stateless splitmix32-style hash PRNG is used instead.

    o_ref[...] = s.astype(o_ref.dtype)


def my_linear_bn_2d(x, w, b, gamma, beta, *, dropout_p=0.1, eps=1e-5, seed=0,
                    tn=128):
    """x: (B, L, Cin) float32.  w: (Cout, Cin) (PyTorch Linear layout)."""
    B, L, Cin = x.shape
    Cout = w.shape[0]
    N = B * L

    # Padding: K and Cout -> multiples of 128 (MXU depth / lane-dense stores),
    # N -> multiple of 16 (bf16 sublane packing).
    k_pad = _round_up(Cin, 128)
    cout_pad = _round_up(Cout, tn)
    n_pad = _round_up(N, 16)

    x2d = jnp.zeros((n_pad, k_pad), jnp.bfloat16).at[:N, :Cin].set(
        x.reshape(N, Cin).astype(jnp.bfloat16))
    wt = jnp.zeros((k_pad, cout_pad), jnp.bfloat16).at[:Cin, :Cout].set(
        jnp.transpose(w).astype(jnp.bfloat16))
    b2 = jnp.zeros((1, cout_pad), jnp.float32).at[:, :Cout].set(
        b.reshape(1, Cout).astype(jnp.float32))
    g2 = jnp.ones((1, cout_pad), jnp.float32).at[:, :Cout].set(
        gamma.reshape(1, Cout).astype(jnp.float32))
    bt2 = jnp.zeros((1, cout_pad), jnp.float32).at[:, :Cout].set(
        beta.reshape(1, Cout).astype(jnp.float32))
    seed_arr = jnp.array([seed], dtype=jnp.int32)

    kernel = functools.partial(
        _linear_bn_silu_dropout_kernel,
        n_valid=N, tn=tn, cout_pad=cout_pad, dropout_p=dropout_p, eps=eps)

    grid = (cout_pad // tn,)

    out2d = pl.pallas_call(
        kernel,
        out_shape=jax.ShapeDtypeStruct((n_pad, cout_pad), jnp.float32),
        grid_spec=pltpu.PrefetchScalarGridSpec(
            num_scalar_prefetch=1,
            grid=grid,
            in_specs=[
                pl.BlockSpec((n_pad, k_pad), lambda j, seed: (0, 0)),  # x
                pl.BlockSpec((k_pad, tn), lambda j, seed: (0, j)),     # W^T tile
                pl.BlockSpec((1, tn), lambda j, seed: (0, j)),         # bias
                pl.BlockSpec((1, tn), lambda j, seed: (0, j)),         # gamma
                pl.BlockSpec((1, tn), lambda j, seed: (0, j)),         # beta
            ],
            out_specs=pl.BlockSpec((n_pad, tn), lambda j, seed: (0, j)),
        ),
        compiler_params=pltpu.CompilerParams(
            dimension_semantics=("parallel",)),
    )(seed_arr, x2d, wt, b2, g2, bt2)

    # TODO(synk): BatchNorm running_mean/running_var state updates are not
    # computed; only the training-mode forward output is produced.
    return out2d[:N, :Cout].reshape(B, L, Cout)


if __name__ == "__main__":
    # Small, deterministic setup consistent with the module:
    #   x: (batch=2, seq=8, in_channels=32), out_channels=64
    B, L, Cin, Cout = 2, 8, 32, 64
    key = jax.random.PRNGKey(0)
    kx, kw, kb = jax.random.split(key, 3)

    x = jax.random.normal(kx, (B, L, Cin), dtype=jnp.float32)

    # nn.Linear-style init (uniform in +/- 1/sqrt(fan_in)), deterministic
    bound = 1.0 / (Cin ** 0.5)
    w = jax.random.uniform(kw, (Cout, Cin), minval=-bound, maxval=bound,
                           dtype=jnp.float32)
    b = jax.random.uniform(kb, (Cout,), minval=-bound, maxval=bound,
                           dtype=jnp.float32)
    # BatchNorm1d affine init: gamma=1, beta=0
    gamma = jnp.ones((Cout,), dtype=jnp.float32)
    beta = jnp.zeros((Cout,), dtype=jnp.float32)

    out = my_linear_bn_2d(x, w, b, gamma, beta, dropout_p=0.1, seed=0)
    out = jax.block_until_ready(out)
    assert out.shape == (B, L, Cout)
    assert bool(jnp.all(jnp.isfinite(out)))
    print("KERNEL_OK")
</pallas_src>

<mosaic_0001>
module attributes {stable_mosaic.version = 11 : i64} {
  func.func @_linear_bn_silu_dropout_kernel(%arg0: i32, %arg1: memref<1xi32, #tpu.memory_space<smem>>, %arg2: memref<16x128xbf16, #tpu.memory_space<vmem>>, %arg3: memref<128x128xbf16, #tpu.memory_space<vmem>>, %arg4: memref<1x128xf32, #tpu.memory_space<vmem>>, %arg5: memref<1x128xf32, #tpu.memory_space<vmem>>, %arg6: memref<1x128xf32, #tpu.memory_space<vmem>>, %arg7: memref<16x128xf32, #tpu.memory_space<vmem>>) attributes {dimension_semantics = [#tpu.dimension_semantics<parallel>], iteration_bounds = array<i64: 1>, scalar_prefetch = 1 : i64, scratch_operands = 0 : i64, tpu.core_type = #tpu.core_type<tc>, window_params = [{pipeline_mode = #tpu.pipeline_mode<synchronous>, transform_indices = @transform_0, window_bounds = array<i64: 16, 128>}, {transform_indices = @transform_1, window_bounds = array<i64: 128, 128>}, {transform_indices = @transform_2, window_bounds = array<i64: 1, 128>}, {transform_indices = @transform_3, window_bounds = array<i64: 1, 128>}, {transform_indices = @transform_4, window_bounds = array<i64: 1, 128>}, {transform_indices = @transform_5, window_bounds = array<i64: 16, 128>}]} {
    %c0 = arith.constant 0 : index
    %c0_0 = arith.constant 0 : index
    %0 = vector.load %arg2[%c0, %c0_0] : memref<16x128xbf16, #tpu.memory_space<vmem>>, vector<16x128xbf16>
    %c0_1 = arith.constant 0 : index
    %c0_2 = arith.constant 0 : index
    %1 = vector.load %arg3[%c0_1, %c0_2] : memref<128x128xbf16, #tpu.memory_space<vmem>>, vector<128x128xbf16>
    %cst = arith.constant dense<0.000000e+00> : vector<16x128xf32>
    %2 = tpu.matmul %0, %1, %cst {dimension_numbers = #tpu.dot_dimension_numbers<[1], [0], [0], [1], [0, 0, 1, 1], [], []>} : vector<16x128xbf16>, vector<128x128xbf16>, vector<16x128xf32> -> vector<16x128xf32>
    %c0_3 = arith.constant 0 : index
    %c0_4 = arith.constant 0 : index
    %3 = vector.load %arg4[%c0_3, %c0_4] : memref<1x128xf32, #tpu.memory_space<vmem>>, vector<1x128xf32>
    %4 = vector.broadcast %3 : vector<1x128xf32> to vector<16x128xf32>
    %5 = arith.addf %2, %4 : vector<16x128xf32>
    %cst_5 = arith.constant dense<0.000000e+00> : vector<128xf32>
    %6 = vector.multi_reduction <add>, %5, %cst_5 [0] : vector<16x128xf32> to vector<128xf32>
    %7 = vector.shape_cast %6 : vector<128xf32> to vector<1x128xf32>
    %cst_6 = arith.constant 6.250000e-02 : f32
    %8 = vector.broadcast %cst_6 : f32 to vector<1x128xf32>
    %9 = arith.mulf %7, %8 : vector<1x128xf32>
    %10 = arith.mulf %5, %5 : vector<16x128xf32>
    %cst_7 = arith.constant dense<0.000000e+00> : vector<128xf32>
    %11 = vector.multi_reduction <add>, %10, %cst_7 [0] : vector<16x128xf32> to vector<128xf32>
    %12 = vector.shape_cast %11 : vector<128xf32> to vector<1x128xf32>
    %cst_8 = arith.constant 6.250000e-02 : f32
    %13 = vector.broadcast %cst_8 : f32 to vector<1x128xf32>
    %14 = arith.mulf %12, %13 : vector<1x128xf32>
    %15 = arith.mulf %9, %9 : vector<1x128xf32>
    %16 = arith.subf %14, %15 : vector<1x128xf32>
    %cst_9 = arith.constant 0.000000e+00 : f32
    %17 = vector.broadcast %cst_9 : f32 to vector<1x128xf32>
    %18 = arith.maximumf %16, %17 : vector<1x128xf32>
    %19 = vector.broadcast %9 : vector<1x128xf32> to vector<16x128xf32>
    %20 = arith.subf %5, %19 : vector<16x128xf32>
    %cst_10 = arith.constant 9.99999974E-6 : f32
    %21 = vector.broadcast %cst_10 : f32 to vector<1x128xf32>
    %22 = arith.addf %18, %21 : vector<1x128xf32>
    %23 = math.rsqrt %22 : vector<1x128xf32>
    %24 = vector.broadcast %23 : vector<1x128xf32> to vector<16x128xf32>
    %25 = arith.mulf %20, %24 : vector<16x128xf32>
    %c0_11 = arith.constant 0 : index
    %c0_12 = arith.constant 0 : index
    %26 = vector.load %arg5[%c0_11, %c0_12] : memref<1x128xf32, #tpu.memory_space<vmem>>, vector<1x128xf32>
    %27 = vector.broadcast %26 : vector<1x128xf32> to vector<16x128xf32>
    %28 = arith.mulf %25, %27 : vector<16x128xf32>
    %c0_13 = arith.constant 0 : index
    %c0_14 = arith.constant 0 : index
    %29 = vector.load %arg6[%c0_13, %c0_14] : memref<1x128xf32, #tpu.memory_space<vmem>>, vector<1x128xf32>
    %30 = vector.broadcast %29 : vector<1x128xf32> to vector<16x128xf32>
    %31 = arith.addf %28, %30 : vector<16x128xf32>
    %32 = arith.negf %31 : vector<16x128xf32>
    %33 = math.exp %32 : vector<16x128xf32>
    %cst_15 = arith.constant 1.000000e+00 : f32
    %34 = vector.broadcast %cst_15 : f32 to vector<16x128xf32>
    %35 = arith.addf %34, %33 : vector<16x128xf32>
    %36 = arith.divf %34, %35 : vector<16x128xf32>
    %37 = arith.mulf %31, %36 : vector<16x128xf32>
    %38 = tpu.iota {dimensions = array<i32: 0>} : vector<16x128xi32>
    %39 = tpu.iota {dimensions = array<i32: 1>} : vector<16x128xi32>
    %c128_i32 = arith.constant 128 : i32
    %40 = arith.muli %arg0, %c128_i32 : i32
    %41 = vector.broadcast %40 : i32 to vector<16x128xi32>
    %42 = arith.addi %39, %41 : vector<16x128xi32>
    %c128_i32_16 = arith.constant 128 : i32
    %43 = vector.broadcast %c128_i32_16 : i32 to vector<16x128xi32>
    %44 = arith.muli %38, %43 : vector<16x128xi32>
    %45 = arith.addi %44, %42 : vector<16x128xi32>
    %c0_17 = arith.constant 0 : index
    %46 = memref.load %arg1[%c0_17] : memref<1xi32, #tpu.memory_space<smem>>
    %c-1640531527_i32 = arith.constant -1640531527 : i32
    %47 = arith.muli %46, %c-1640531527_i32 : i32
    %48 = vector.broadcast %47 : i32 to vector<16x128xi32>
    %49 = arith.addi %45, %48 : vector<16x128xi32>
    %c16_i32 = arith.constant 16 : i32
    %50 = vector.broadcast %c16_i32 : i32 to vector<16x128xi32>
    %51 = arith.shrui %49, %50 : vector<16x128xi32>
    %52 = arith.xori %49, %51 : vector<16x128xi32>
    %c-2048144789_i32 = arith.constant -2048144789 : i32
    %53 = vector.broadcast %c-2048144789_i32 : i32 to vector<16x128xi32>
    %54 = arith.muli %52, %53 : vector<16x128xi32>
    %c13_i32 = arith.constant 13 : i32
    %55 = vector.broadcast %c13_i32 : i32 to vector<16x128xi32>
    %56 = arith.shrui %54, %55 : vector<16x128xi32>
    %57 = arith.xori %54, %56 : vector<16x128xi32>
    %c-1028477387_i32 = arith.constant -1028477387 : i32
    %58 = vector.broadcast %c-1028477387_i32 : i32 to vector<16x128xi32>
    %59 = arith.muli %57, %58 : vector<16x128xi32>
    %c16_i32_18 = arith.constant 16 : i32
    %60 = vector.broadcast %c16_i32_18 : i32 to vector<16x128xi32>
    %61 = arith.shrui %59, %60 : vector<16x128xi32>
    %62 = arith.xori %59, %61 : vector<16x128xi32>
    %c1_i32 = arith.constant 1 : i32
    %63 = vector.broadcast %c1_i32 : i32 to vector<16x128xi32>
    %64 = arith.shrui %62, %63 : vector<16x128xi32>
    %c214748365_i32 = arith.constant 214748365 : i32
    %65 = vector.broadcast %c214748365_i32 : i32 to vector<16x128xi32>
    %66 = arith.cmpi sge, %64, %65 : vector<16x128xi32>
    %cst_19 = arith.constant 1.11111116 : f32
    %67 = vector.broadcast %cst_19 : f32 to vector<16x128xf32>
    %68 = arith.mulf %37, %67 : vector<16x128xf32>
    %cst_20 = arith.constant 0.000000e+00 : f32
    %69 = vector.broadcast %cst_20 : f32 to vector<16x128xf32>
    %70 = arith.select %66, %68, %69 : vector<16x128xi1>, vector<16x128xf32>
    %c0_21 = arith.constant 0 : index
    %c0_22 = arith.constant 0 : index
    %71 = vector.load %arg7[%c0_21, %c0_22] : memref<16x128xf32, #tpu.memory_space<vmem>>, vector<16x128xf32>
    tpu.vector_store %arg7[%c0_21, %c0_22], %70 {strides = array<i32>} : memref<16x128xf32, #tpu.memory_space<vmem>>, vector<16x128xf32>,
    return
  }
  func.func @transform_0(%arg0: i32, %arg1: memref<1xi32, #tpu.memory_space<smem>>) -> (i32, i32) {
    %c0_i32 = arith.constant 0 : i32
    %c0_i32_0 = arith.constant 0 : i32
    %c0_i32_1 = arith.constant 0 : i32
    return %c0_i32, %c0_i32_0 : i32, i32
  }
  func.func @transform_1(%arg0: i32, %arg1: memref<1xi32, #tpu.memory_space<smem>>) -> (i32, i32) {
    %c0_i32 = arith.constant 0 : i32
    %c0_i32_0 = arith.constant 0 : i32
    return %c0_i32, %arg0 : i32, i32
  }
  func.func @transform_2(%arg0: i32, %arg1: memref<1xi32, #tpu.memory_space<smem>>) -> (i32, i32) {
    %c0_i32 = arith.constant 0 : i32
    %c0_i32_0 = arith.constant 0 : i32
    return %c0_i32, %arg0 : i32, i32
  }
  func.func @transform_3(%arg0: i32, %arg1: memref<1xi32, #tpu.memory_space<smem>>) -> (i32, i32) {
    %c0_i32 = arith.constant 0 : i32
    %c0_i32_0 = arith.constant 0 : i32
    return %c0_i32, %arg0 : i32, i32
  }
  func.func @transform_4(%arg0: i32, %arg1: memref<1xi32, #tpu.memory_space<smem>>) -> (i32, i32) {
    %c0_i32 = arith.constant 0 : i32
    %c0_i32_0 = arith.constant 0 : i32
    return %c0_i32, %arg0 : i32, i32
  }
  func.func @transform_5(%arg0: i32, %arg1: memref<1xi32, #tpu.memory_space<smem>>) -> (i32, i32) {
    %c0_i32 = arith.constant 0 : i32
    %c0_i32_0 = arith.constant 0 : i32
    return %c0_i32, %arg0 : i32, i32
  }
}

</mosaic_0001>

<bundles_post_ra>
// kernel: tpu_custom_call.1
= control target key start
LH: loop header
LB: loop body
LE: loop exit
PB: predicated region body
PF: predicated region fallthrough
CT: control target
= control target key end

     0   :  { %12 = vsyncpa [#allocation5], 0  ;;  %s494_s0 = inlined_call_operand.<no memory space> [shape: s32[1], index: 0, kind: input, shape index: {}]   ;;  %s495_s1 = inlined_call_operand.hbm [shape: bf16[16,128], index: 1, kind: input, shape index: {}]   ;;  %s496_s2 = inlined_call_operand.hbm [shape: bf16[128,128], index: 2, kind: input, shape index: {}]   ;;  %s497_s3 = inlined_call_operand.vmem [shape: f32[1,128], index: 3, kind: input, shape index: {}]   ;;  %s498_s4 = inlined_call_operand.vmem [shape: f32[1,128], index: 4, kind: input, shape index: {}]   ;;  %s499_s5 = inlined_call_operand.vmem [shape: f32[1,128], index: 5, kind: input, shape index: {}]   ;;  %s500_s6 = inlined_call_operand.hbm [shape: f32[16,128], index: 6, kind: output, shape index: {}]  }
   0x1   :  { %13 = vsyncpa [#allocation8], 0 }
   0x2   :  { %14 = vsyncpa [#allocation6], 0  ;;  %s429_s21 = smov [#allocation4]  }
   0x3   :  { %s20_s22 = sshll.u32 %s429_s21, 4  ;;  %s21_s22 = int_to_ptr.vmem [resolvable:$true] %s20_s22 }
   0x4   :  { %s371_s23 = scalar_lea.vmem %s21_s22, 128  ;;  %p376_p1 = scmp.lt.s32.totalorder %s21_s22, %s21_s22 }
   0x5   :  { %p372_p0 = scmp.ne.s32.totalorder %s21_s22, %s371_s23  ;;  %p377_p2 = scmp.lt.s32.totalorder %s371_s23, %s371_s23 }
   0x7   :  { %p378_p3 = por %p377_p2, %p376_p1 }
   0x9   :  { %p379_p4 = pnand %p378_p3, %p372_p0 }
   0xb   :  { %382 = shalt.err (!%p379_p4)
}
   0xc   :  { %s430_s24 = smov 64   ;;  %s431_s25 = smov 4  }
   0xd   :  { %26 = dma.hbm_to_vmem [thread:$0]  %s495_s1, 128, %s21_s22, [#allocation5], %s430_s24, %s430_s24, %s431_s25  }
   0xe   :  { %s432_s28 = smov [#allocation7]  }
   0xf   :  { %s32_s29 = sshll.u32 %s432_s28, 4  ;;  %s33_s29 = int_to_ptr.vmem [resolvable:$true] %s32_s29 }
  0x10   :  { %s391_s30 = scalar_lea.vmem %s33_s29, 1024  ;;  %p396_p6 = scmp.lt.s32.totalorder %s33_s29, %s33_s29 }
  0x11   :  { %p392_p5 = scmp.ne.s32.totalorder %s33_s29, %s391_s30  ;;  %p397_p7 = scmp.lt.s32.totalorder %s391_s30, %s391_s30 }
  0x13   :  { %p398_p8 = por %p397_p7, %p396_p6 }
  0x15   :  { %p399_p9 = pnand %p398_p8, %p392_p5 }
  0x17   :  { %402 = shalt.err (!%p399_p9)
}
  0x18   :  { %38 = dma.hbm_to_vmem [thread:$0]  %s496_s2, 1024, %s33_s29, [#allocation8], %s430_s24, %s430_s24, %s431_s25  }
  0x19   :  { %423 = dma.done.wait [#allocation5], 128  }
  0x1a   :  { %424 = vsyncadd [#allocation5], 4294967168 }
  0x1b   :  { %425 = dma.done.wait [#allocation8], 1024  }
  0x1c   :  { %426 = vsyncadd [#allocation8], 4294966272  ;;  %v433_v0 = vmov 0.0   ;;  %vm434_vm0 = vmmov 0   ;;  %v344_v1 = vld [vmem:[#allocation7 + $0x38] sm:$0xff]   ;;  %v345_v2 = vld [vmem:[#allocation7 + $0x30] sm:$0xff]   ;;  %v231_v37 = vlaneseq }
  0x1d   :  { %315 = vmatprep.subr.bf16.mxu0 %v433_v0  ;;  %331 = vmatprep.mubr.msk.bf16.mxu0 %vm434_vm0, %v433_v0  ;;  %v346_v3 = vld [vmem:[#allocation7 + $0x28] sm:$0xff]   ;;  %v347_v4 = vld [vmem:[#allocation7 + $0x20] sm:$0xff]   ;;  %v348_v5 = vld [vmem:[#allocation7 + $0x18] sm:$0xff]   ;;  %s244_s10 = smul.u32 2654435769, %s494_s0  ;;  %s435_s0 = smov [#allocation9]  }
  0x1e   :  { %316 = vmatpush3.bf16.msra.mxu0 %v344_v1  ;;  %v349_v6 = vld [vmem:[#allocation7 + $0x10] sm:$0xff]   ;;  %v350_v7 = vld [vmem:[#allocation7 + $0x8] sm:$0xff]   ;;  %v351_v8 = vld [vmem:[#allocation7] sm:$0xff]   ;;  %v232_v40 = vshrl.u32 %v231_v37, 7  ;;  %v235_v42 = vand.u32 127, %v231_v37 }
  0x1f   :  { %317 = vmatprep.subr.bf16.mxu0 %v433_v0  ;;  %v352_v9 = vld [vmem:[#allocation4] sm:$0xff]   ;;  %v245_v47 = vstv %s244_s10 }
  0x20   :  { %v292_v10 = vld [vmem:[%s497_s3] ss:$0 sm:$0xff]  ;;  %v233_v41 = vadd.s32 8, %v232_v40  ;;  %v239_v43 = vmul.u32 128, %v232_v40 }
  0x21   :  { %v302_v51 = vld [vmem:[%s498_s4] ss:$0 sm:$0xff]  ;;  %s279_s4 = sshll.u32 %s435_s0, 4  ;;  %s280_s4 = int_to_ptr.vmem [resolvable:$true] %s279_s4 }
  0x22   :  { %318 = vmatpush3.bf16.msra.mxu0 %v345_v2  ;;  %v240_v44 = vmul.u32 128, %v233_v41  ;;  %v241_v45 = vadd.s32 %v239_v43, %v235_v42  ;;  %v303_v56 = vld [vmem:[%s499_s5] ss:$0 sm:$0xff]  ;;  %s403_s5 = scalar_lea.vmem %s280_s4, 256  ;;  %p408_p11 = scmp.lt.s32.totalorder %s280_s4, %s280_s4 }
  0x23   :  { %319 = vmatprep.subr.bf16.mxu0 %v433_v0  ;;  %p404_p10 = scmp.ne.s32.totalorder %s280_s4, %s403_s5  ;;  %p409_p12 = scmp.lt.s32.totalorder %s403_s5, %s403_s5 }
  0x24   :  { %v242_v46 = vadd.s32 %v240_v44, %v235_v42  ;;  %v246_v52 = vadd.s32 %v245_v47, %v241_v45 }
  0x25   :  { %p410_p13 = por %p409_p12, %p408_p11 }
  0x26   :  { %320 = vmatpush3.bf16.msra.mxu0 %v346_v3  ;;  %v247_v55 = vadd.s32 %v245_v47, %v242_v46  ;;  %v248_v59 = vshrl.u32 %v246_v52, 16 }
  0x27   :  { %321 = vmatprep.subr.bf16.mxu0 %v433_v0  ;;  %p411_p0 = pnand %p410_p13, %p404_p10 }
  0x28   :  { %v249_v62 = vshrl.u32 %v247_v55, 16  ;;  %v250_v1 = vxor.u32 %v248_v59, %v246_v52 }
  0x2a   :  { %322 = vmatpush3.bf16.msra.mxu0 %v347_v4  ;;  %v251_v2 = vxor.u32 %v249_v62, %v247_v55  ;;  %v252_v3 = vmul.u32 2246822507, %v250_v1 }
  0x2b   :  { %323 = vmatprep.subr.bf16.mxu0 %v433_v0 }
  0x2c   :  { %v253_v4 = vmul.u32 2246822507, %v251_v2 }
  0x2e   :  { %324 = vmatpush3.bf16.msra.mxu0 %v348_v5  ;;  %v254_v5 = vshrl.u32 %v252_v3, 13 }
  0x2f   :  { %325 = vmatprep.subr.bf16.mxu0 %v433_v0 }
  0x32   :  { %326 = vmatpush3.bf16.msra.mxu0 %v349_v6  ;;  %v255_v6 = vshrl.u32 %v253_v4, 13 }
  0x33   :  { %327 = vmatprep.subr.bf16.mxu0 %v433_v0 }
  0x36   :  { %328 = vmatpush3.bf16.msra.mxu0 %v350_v7  ;;  %v256_v7 = vxor.u32 %v254_v5, %v252_v3 }
  0x37   :  { %329 = vmatprep.subr.bf16.mxu0 %v433_v0 }
  0x3a   :  { %330 = vmatpush3.bf16.msra.mxu0 %v351_v8  ;;  %v257_v8 = vxor.u32 %v255_v6, %v253_v4 }
  0x3d   :  { %332 = vmatmul.mubr.bf16.vlgmr.msra.gmra.mxu0 %v352_v9 }
  0xfd   :  { %v165_v11 = vpop.f32.mrf.mxu0 }
  0xfe   :  { %v166_v13 = vadd.f32 %v292_v10, %v165_v11 }
  0xff   :  { %v333_v12 = vpop.f32.mrf.mxu0 }
 0x100   :  { %v180_v17 = vmul.f32 %v166_v13, %v166_v13 }
 0x101   :  { %v168_v14 = vpop.f32.mrf.mxu0 }
 0x102   :  { %v169_v15 = vadd.f32 %v292_v10, %v168_v14  ;;  %v259_v14 = vmul.u32 3266489909, %v257_v8 }
 0x103   :  { %v334_v16 = vpop.f32.mrf.mxu0 }
 0x104   :  { %v172_v18 = vadd.f32 %v169_v15, %v166_v13  ;;  %v181_v19 = vmul.f32 %v169_v15, %v169_v15  ;;  %v261_v16 = vshrl.u32 %v259_v14, 16 }
 0x106   :  { %v173_v20 = vrot.slane %v172_v18, 4  ;;  %v182_v21 = vadd.f32 %v181_v19, %v180_v17 }
 0x108   :  { %v174_v22 = vadd.f32 %v173_v20, %v172_v18  ;;  %v183_v23 = vrot.slane %v182_v21, 4  ;;  %v263_v18 = vxor.u32 %v261_v16, %v259_v14 }
 0x10a   :  { %v175_v24 = vrot.slane %v174_v22, 2  ;;  %v184_v25 = vadd.f32 %v183_v23, %v182_v21  ;;  %v265_v20 = vshrl.u32 %v263_v18, 1 }
 0x10c   :  { %v176_v26 = vadd.f32 %v175_v24, %v174_v22  ;;  %v185_v27 = vrot.slane %v184_v25, 2  ;;  %vm267_vm2 = vcmp.ge.s32.totalorder %v265_v20, 214748365 }
 0x10e   :  { %v177_v28 = vrot.slane %v176_v26, 1  ;;  %v186_v29 = vadd.f32 %v185_v27, %v184_v25 }
 0x110   :  { %v178_v30 = vadd.f32 %v177_v28, %v176_v26  ;;  %v187_v31 = vrot.slane %v186_v29, 1 }
 0x112   :  { %v179_v32 = vmul.f32 0.0625, %v178_v30  ;;  %v188_v33 = vadd.f32 %v187_v31, %v186_v29 }
 0x114   :  { %v189_v34 = vmul.f32 0.0625, %v188_v33  ;;  %v190_v35 = vmul.f32 %v179_v32, %v179_v32  ;;  %v193_v48 = vsub.f32 %v166_v13, %v179_v32  ;;  %v194_v49 = vsub.f32 %v169_v15, %v179_v32 }
 0x115   :  { %v258_v13 = vmul.u32 3266489909, %v256_v7 }
 0x116   :  { %v191_v36 = vsub.f32 %v189_v34, %v190_v35 }
 0x117   :  { %v260_v15 = vshrl.u32 %v258_v13, 16 }
 0x118   :  { %v192_v38 = vmax.f32 %v191_v36, 0.0 }
 0x119   :  { %v262_v17 = vxor.u32 %v260_v15, %v258_v13 }
 0x11a   :  { %v195_v39 = vadd.f32 1e-05, %v192_v38 }
 0x11b   :  { %v264_v19 = vshrl.u32 %v262_v17, 1 }
 0x11c   :  { %353 = vrsqrt.f32 %v195_v39 }
 0x11d   :  { %vm266_vm1 = vcmp.ge.s32.totalorder %v264_v19, 214748365 }
 0x129   :  { %v354_v50 = vpop.eup %353 }
 0x12a   :  { %v197_v53 = vmul.f32 %v354_v50, %v193_v48  ;;  %v198_v54 = vmul.f32 %v354_v50, %v194_v49 }
 0x12c   :  { %v206_v57 = vmul.f32 %v302_v51, %v197_v53  ;;  %v207_v58 = vmul.f32 %v302_v51, %v198_v54 }
 0x12e   :  { %v215_v60 = vadd.f32 %v303_v56, %v206_v57  ;;  %v216_v61 = vadd.f32 %v303_v56, %v207_v58 }
 0x130   :  { %v304_v63 = vmul.f32 -1.442695, %v215_v60  ;;  %v305_v0 = vmul.f32 -1.442695, %v216_v61 }
 0x132   :  { %355 = vpow2.f32 %v304_v63 }
 0x133   :  { %357 = vpow2.f32 %v305_v0 }
 0x13f   :  { %v356_v9 = vpop.eup %355 }
 0x140   :  { %v358_v10 = vpop.eup %357  ;;  %v223_v11 = vadd.f32 1.0, %v356_v9 }
 0x141   :  { %v224_v12 = vadd.f32 1.0, %v358_v10 }
 0x142   :  { %359 = vrcp.f32 %v223_v11 }
 0x143   :  { %361 = vrcp.f32 %v224_v12 }
 0x14f   :  { %v360_v21 = vpop.eup %359 }
 0x150   :  { %v362_v22 = vpop.eup %361  ;;  %v229_v23 = vmul.f32 %v360_v21, %v215_v60 }
 0x151   :  { %v230_v24 = vmul.f32 %v362_v22, %v216_v61 }
 0x152   :  { %v268_v25 = vmul.f32 1.1111112, %v229_v23 }
 0x153   :  { %v269_v26 = vmul.f32 1.1111112, %v230_v24 }
 0x154   :  { %v270_v27 = vsel %vm266_vm1, %v268_v25, 0.0 }
 0x155   :  { %v271_v28 = vsel %vm267_vm2, %v269_v26, 0.0  ;;  %272 = vst [vmem:[#allocation9] sm:$0xff] %v270_v27 }
 0x156   :  { %273 = vst [vmem:[#allocation9 + $0x8] sm:$0xff] %v271_v28 }
 0x157   :  { %414 = shalt.err (!%p411_p0)
}
 0x158   :  { %s436_s15 = smov 128   ;;  %s437_s16 = smov 8  }
 0x159   :  { %285 = dma.vmem_to_hbm [thread:$0]  %s280_s4, 256, %s500_s6, [#allocation6], %s436_s15, %s436_s15, %s437_s16  }
 0x15a   :  { %427 = dma.done.wait [#allocation6], 256  }
 0x15b   :  { %428 = vsyncadd [#allocation6], 4294967040 }
 0x15c   :  { %289 = vsyncpa [#allocation5], 1 }
 0x15d   :  { %290 = vsyncpa [#allocation8], 1 }
 0x15e   :  { %291 = vsyncpa [#allocation6], 1 }

</bundles_post_ra>
